<compile_context>
chip_gen: v6e
topology: v6e:2x2x1
jax: 0.10.0
libtpu: 0.0.40
codegen_flags: <defaults>
</compile_context>

<pallas_src>
import math
from functools import partial

import jax
import jax.numpy as jnp
from jax import lax
from jax.experimental import pallas as pl
from jax.experimental.pallas import tpu as pltpu


def _round_up(x, m):
    return ((x + m - 1) // m) * m


def _logreg_kernel(x_ref, w_ref, o_ref, acc_ref, *, f_total, tk):
    # x_ref:   (tb, tk)  batch/feature tile of x
    # w_ref:   (8, tk)   weight tile (row 0 is the real weight, rows 1..7 are zero pad)
    # o_ref:   (1, tb)   lane-dense output tile (block of the (1, nb*tb) output row)
    # acc_ref: (8, tb)   f32 accumulator, resident across the feature (k) axis
    k = pl.program_id(1)
    nk = pl.num_programs(1)

    @pl.when(k == 0)
    def _():
        acc_ref[...] = jnp.zeros_like(acc_ref)

    x = x_ref[...]
    w = w_ref[...]
    if f_total % tk != 0:
        # Last feature tile reads past F: zero the out-of-range lanes of BOTH operands so
        # stale-VMEM inf/nan can never produce 0*inf = nan in the accumulator.
        rem = f_total - k * tk
        w = jnp.where(lax.broadcasted_iota(jnp.int32, w.shape, 1) < rem, w, 0).astype(w_ref.dtype)
        x = jnp.where(lax.broadcasted_iota(jnp.int32, x.shape, 1) < rem, x, 0).astype(x_ref.dtype)

    # (8, tk) . (tb, tk)^T -> (8, tb): contracting the feature axis of both operands puts
    # the batch dimension on lanes, so the store below is lane-dense with no relayout.
    acc_ref[...] += lax.dot_general(
        w, x,
        dimension_numbers=(((1,), (1,)), ((), ())),
        preferred_element_type=jnp.float32,
    )

    @pl.when(k == nk - 1)
    def _():
        z = acc_ref[...][0:1, :]                       # real weight lives in row 0
        # exact sigmoid (no approx reciprocal) to keep 1e-5 agreement with the reference
        o_ref[...] = (1.0 / (1.0 + jnp.exp(-z))).astype(o_ref.dtype)


def _tpu_vmem_capacity_bytes():
    try:
        return int(pltpu.get_tpu_info().vmem_capacity_bytes)
    except Exception:
        return 64 << 20                                 # v7x-safe fallback


def _choose_tiles(batch, n_features, itemsize, x_block_target):
    f_pad = _round_up(n_features, 128)
    row_bytes = f_pad * itemsize
    rows = (x_block_target // row_bytes) // 128 * 128   # 128-aligned rows per block

    if rows >= 128:
        tk = n_features                                 # whole feature dim per block
        if batch <= rows:
            if batch >= 2048:
                # Whole batch fits one block: split into 2 parallel steps so both v7x
                # TensorCores get work (costs ~0.35 us on single-TC parts, negligible).
                tb = _round_up(pl.cdiv(batch, 2), 128)
            else:
                tb = batch                              # single full-batch block
        else:
            tb = rows
            nb = pl.cdiv(batch, tb)
            if nb > 1 and nb % 2 == 1:                  # even step count for megacore
                tb_alt = _round_up(pl.cdiv(batch, nb + 1), 128)
                if tb_alt >= 128:
                    tb = tb_alt
    else:
        # Feature dim too wide for a >=128-row block: tile the reduction axis.
        tb = batch if batch < 256 else 256
        tk = (x_block_target // (_round_up(tb, 8) * itemsize)) // 128 * 128
        tk = max(128, min(tk, f_pad))
    return tb, tk


def logistic_regression_forward(x, weight):
    """sigmoid(x @ weight.T) with weight in PyTorch nn.Linear layout.

    x: (B, F); weight: (1, F)  ->  (B, 1) float32.
    """
    B, F = x.shape
    assert weight.shape == (1, F)
    itemsize = jnp.dtype(x.dtype).itemsize

    vmem_cap = _tpu_vmem_capacity_bytes()
    # ~1/5 of VMEM per x block (double-buffered x ~= 40% of VMEM), capped at 24 MiB:
    # v7x (64 MiB VMEM) -> ~12.8 MiB blocks; v5e/v6e (128 MiB) -> 24 MiB blocks.
    x_block_target = max(4 << 20, min(vmem_cap // 5, 24 << 20))

    tb, tk = _choose_tiles(B, F, itemsize, x_block_target)
    nb = pl.cdiv(B, tb)
    nk = pl.cdiv(F, tk)

    # Weight stays lane-major (1, F); pad to 8 sublanes (free: same tiled footprint).
    w8 = jnp.pad(weight.astype(x.dtype), ((0, 7), (0, 0)))

    # Real (8,128)-tiled VMEM footprints; inputs/outputs double-buffered, scratch not.
    x_blk = _round_up(tb, 8) * _round_up(tk, 128) * itemsize
    w_blk = 8 * _round_up(tk, 128) * itemsize
    o_blk = 8 * _round_up(tb, 128) * 4
    acc_blk = 8 * _round_up(tb, 128) * 4
    need = 2 * (x_blk + w_blk + o_blk) + acc_blk
    vmem_limit = min(max(32 << 20, 2 * need + (8 << 20)), (3 * vmem_cap) // 4)
    vmem_limit = min(max(vmem_limit, need + (4 << 20)), vmem_cap - (4 << 20))

    kernel = partial(_logreg_kernel, f_total=F, tk=tk)

    out_row = pl.pallas_call(
        kernel,
        out_shape=jax.ShapeDtypeStruct((1, nb * tb), jnp.float32),
        grid_spec=pltpu.PrefetchScalarGridSpec(
            num_scalar_prefetch=0,
            grid=(nb, nk),                              # batch parallel, features reduced
            in_specs=[
                pl.BlockSpec((tb, tk), lambda i, k: (i, k)),
                pl.BlockSpec((8, tk), lambda i, k: (0, k)),
            ],
            out_specs=pl.BlockSpec((1, tb), lambda i, k: (0, i)),
            scratch_shapes=[pltpu.VMEM((8, tb), jnp.float32)],
        ),
        compiler_params=pltpu.CompilerParams(
            dimension_semantics=("parallel", "arbitrary"),
            vmem_limit_bytes=int(vmem_limit),
        ),
    )(x, w8)

    return out_row[0, :B].reshape(B, 1)


def init_params(n_features, key):
    # torch.nn.Linear default init on a (1, n_features) weight:
    # U(-1/sqrt(fan_in), 1/sqrt(fan_in)) with fan_in = n_features. (bias=False in module.)
    bound = 1.0 / math.sqrt(n_features)
    return jax.random.uniform(key, (1, n_features), jnp.float32, -bound, bound)


if __name__ == "__main__":
    n_features = 32
    batch = 8

    key = jax.random.PRNGKey(0)
    kx, kw = jax.random.split(key)

    x = jax.random.normal(kx, (batch, n_features), dtype=jnp.float32)
    weight = init_params(n_features, kw)                # (1, n_features), PyTorch layout

    y = jax.block_until_ready(logistic_regression_forward(x, weight))

    # Reference: torch.sigmoid(self.linear(x)) == sigmoid(x @ weight.T)
    y_ref = jax.nn.sigmoid(x @ weight.T)
    assert y.shape == (batch, 1)
    assert jnp.allclose(y, y_ref, atol=1e-5, rtol=1e-5)

    print("KERNEL_OK")
</pallas_src>

<mosaic_0001>
module attributes {stable_mosaic.version = 11 : i64} {
  func.func @_logreg_kernel(%arg0: i32, %arg1: i32, %arg2: memref<8x32xf32, #tpu.memory_space<vmem>>, %arg3: memref<8x32xf32, #tpu.memory_space<vmem>>, %arg4: memref<1x8xf32, #tpu.memory_space<vmem>>, %arg5: memref<8x8xf32, #tpu.memory_space<vmem>>) attributes {dimension_semantics = [#tpu.dimension_semantics<parallel>, #tpu.dimension_semantics<arbitrary>], iteration_bounds = array<i64: 1, 1>, scalar_prefetch = 0 : i64, scratch_operands = 1 : i64, tpu.core_type = #tpu.core_type<tc>, window_params = [{transform_indices = @transform_0, window_bounds = array<i64: 8, 32>}, {transform_indices = @transform_1, window_bounds = array<i64: 8, 32>}, {transform_indices = @transform_2, window_bounds = array<i64: 1, 8>}]} {
    %c0_i32 = arith.constant 0 : i32
    %0 = arith.cmpi eq, %arg1, %c0_i32 : i32
    %1 = arith.extui %0 : i1 to i32
    %c0_i32_0 = arith.constant 0 : i32
    %2 = arith.cmpi ne, %1, %c0_i32_0 : i32
    scf.if %2 {
      %cst_10 = arith.constant 0.000000e+00 : f32
      %12 = vector.broadcast %cst_10 : f32 to vector<8x8xf32>
      %c0_11 = arith.constant 0 : index
      %c0_12 = arith.constant 0 : index
      %13 = vector.load %arg5[%c0_11, %c0_12] : memref<8x8xf32, #tpu.memory_space<vmem>>, vector<8x8xf32>
      tpu.vector_store %arg5[%c0_11, %c0_12], %12 {strides = array<i32>} : memref<8x8xf32, #tpu.memory_space<vmem>>, vector<8x8xf32>,
    } else {
    }
    %c0 = arith.constant 0 : index
    %c0_1 = arith.constant 0 : index
    %3 = vector.load %arg2[%c0, %c0_1] : memref<8x32xf32, #tpu.memory_space<vmem>>, vector<8x32xf32>
    %c0_2 = arith.constant 0 : index
    %c0_3 = arith.constant 0 : index
    %4 = vector.load %arg3[%c0_2, %c0_3] : memref<8x32xf32, #tpu.memory_space<vmem>>, vector<8x32xf32>
    %c0_4 = arith.constant 0 : index
    %c0_5 = arith.constant 0 : index
    %5 = vector.load %arg5[%c0_4, %c0_5] : memref<8x8xf32, #tpu.memory_space<vmem>>, vector<8x8xf32>
    %cst = arith.constant dense<0.000000e+00> : vector<8x8xf32>
    %6 = tpu.matmul %4, %3, %cst {dimension_numbers = #tpu.dot_dimension_numbers<[1], [1], [0], [0], [0, 0, 1, 0], [], []>} : vector<8x32xf32>, vector<8x32xf32>, vector<8x8xf32> -> vector<8x8xf32>
    %7 = arith.addf %5, %6 : vector<8x8xf32>
    %c0_6 = arith.constant 0 : index
    %c0_7 = arith.constant 0 : index
    %8 = vector.load %arg5[%c0_6, %c0_7] : memref<8x8xf32, #tpu.memory_space<vmem>>, vector<8x8xf32>
    tpu.vector_store %arg5[%c0_6, %c0_7], %7 {strides = array<i32>} : memref<8x8xf32, #tpu.memory_space<vmem>>, vector<8x8xf32>,
    %c0_i32_8 = arith.constant 0 : i32
    %9 = arith.cmpi eq, %arg1, %c0_i32_8 : i32
    %10 = arith.extui %9 : i1 to i32
    %c0_i32_9 = arith.constant 0 : i32
    %11 = arith.cmpi ne, %10, %c0_i32_9 : i32
    scf.if %11 {
      %c0_10 = arith.constant 0 : index
      %c0_11 = arith.constant 0 : index
      %12 = vector.load %arg5[%c0_10, %c0_11] : memref<8x8xf32, #tpu.memory_space<vmem>>, vector<8x8xf32>
      %13 = vector.extract_strided_slice %12 {offsets = [0, 0], sizes = [1, 8], strides = [1, 1]} : vector<8x8xf32> to vector<1x8xf32>
      %cst_12 = arith.constant 0.000000e+00 : f32
      %14 = vector.broadcast %cst_12 : f32 to vector<1x8xf32>
      %15 = arith.subf %14, %13 : vector<1x8xf32>
      %16 = math.exp %15 : vector<1x8xf32>
      %cst_13 = arith.constant 1.000000e+00 : f32
      %17 = vector.broadcast %cst_13 : f32 to vector<1x8xf32>
      %18 = arith.addf %17, %16 : vector<1x8xf32>
      %cst_14 = arith.constant 1.000000e+00 : f32
      %19 = vector.broadcast %cst_14 : f32 to vector<1x8xf32>
      %20 = arith.divf %19, %18 : vector<1x8xf32>
      %c0_15 = arith.constant 0 : index
      %c0_16 = arith.constant 0 : index
      %21 = vector.load %arg4[%c0_15, %c0_16] : memref<1x8xf32, #tpu.memory_space<vmem>>, vector<1x8xf32>
      tpu.vector_store %arg4[%c0_15, %c0_16], %20 {strides = array<i32>} : memref<1x8xf32, #tpu.memory_space<vmem>>, vector<1x8xf32>,
    } else {
    }
    return
  }
  func.func @transform_0(%arg0: i32, %arg1: i32) -> (i32, i32) {
    %c0_i32 = arith.constant 0 : i32
    return %arg0, %arg1 : i32, i32
  }
  func.func @transform_1(%arg0: i32, %arg1: i32) -> (i32, i32) {
    %c0_i32 = arith.constant 0 : i32
    %c0_i32_0 = arith.constant 0 : i32
    return %c0_i32, %arg1 : i32, i32
  }
  func.func @transform_2(%arg0: i32, %arg1: i32) -> (i32, i32) {
    %c0_i32 = arith.constant 0 : i32
    %c0_i32_0 = arith.constant 0 : i32
    return %c0_i32, %arg0 : i32, i32
  }
}

</mosaic_0001>

<bundles_post_ra>
// kernel: tpu_custom_call.1
= control target key start
LH: loop header
LB: loop body
LE: loop exit
PB: predicated region body
PF: predicated region fallthrough
CT: control target
= control target key end

     0   :  { %7 = vsyncpa [#allocation4], 0  ;;  %s266_s0 = inlined_call_operand.hbm [shape: f32[8,32], index: 0, kind: input, shape index: {}]   ;;  %s267_s1 = inlined_call_operand.hbm [shape: f32[8,32], index: 1, kind: input, shape index: {}]   ;;  %s268_s2 = inlined_call_operand.hbm [shape: f32[1,8], index: 2, kind: output, shape index: {}]  }
   0x1   :  { %8 = vsyncpa [#allocation7], 0 }
   0x2   :  { %9 = vsyncpa [#allocation5], 0  ;;  %s237_s9 = smov [#allocation3]   ;;  %s238_s11 = smov [#allocation6]  }
   0x3   :  { %s16_s10 = sshll.u32 %s237_s9, 4  ;;  %s26_s12 = sshll.u32 %s238_s11, 4  ;;  %s17_s10 = int_to_ptr.vmem [resolvable:$true] %s16_s10  ;;  %s27_s12 = int_to_ptr.vmem [resolvable:$true] %s26_s12 }
   0x4   :  { %s179_s13 = scalar_lea.vmem %s17_s10, 128  ;;  %p184_p1 = scmp.lt.s32.totalorder %s17_s10, %s17_s10 }
   0x5   :  { %p180_p0 = scmp.ne.s32.totalorder %s17_s10, %s179_s13  ;;  %p185_p2 = scmp.lt.s32.totalorder %s179_s13, %s179_s13 }
   0x7   :  { %p186_p3 = por %p185_p2, %p184_p1 }
   0x9   :  { %p187_p4 = pnand %p186_p3, %p180_p0 }
   0xb   :  { %190 = shalt.err (!%p187_p4)
}
   0xc   :  { %19 = dma.hbm_to_vmem [thread:$0]  %s266_s0, 128, %s17_s10, [#allocation4]  }
   0xd   :  { %s199_s16 = scalar_lea.vmem %s27_s12, 128  ;;  %p204_p6 = scmp.lt.s32.totalorder %s27_s12, %s27_s12 }
   0xe   :  { %p200_p5 = scmp.ne.s32.totalorder %s27_s12, %s199_s16  ;;  %p205_p7 = scmp.lt.s32.totalorder %s199_s16, %s199_s16 }
  0x10   :  { %p206_p8 = por %p205_p7, %p204_p6 }
  0x12   :  { %p207_p9 = pnand %p206_p8, %p200_p5 }
  0x14   :  { %210 = shalt.err (!%p207_p9)
}
  0x15   :  { %29 = dma.hbm_to_vmem [thread:$0]  %s267_s1, 128, %s27_s12, [#allocation7]  }
  0x16   :  { %231 = dma.done.wait [#allocation4], 128  }
  0x17   :  { %232 = vsyncadd [#allocation4], 4294967168 }
  0x18   :  { %233 = dma.done.wait [#allocation7], 128  }
  0x19   :  { %234 = vsyncadd [#allocation7], 4294967168  ;;  %vm40_vm0 = vcmask 64512   ;;  %v239_v0 = vmov 0.0   ;;  %vm240_vm1 = vmmov 0   ;;  %vm45_vm2 = vcmask 261120  }
  0x1a   :  { %41 = vst.msk [vmem:[#allocation2] sm:$0xff] %vm40_vm0, %v239_v0  ;;  %157 = vmatprep.subr.mxu0 %v239_v0  ;;  %159 = vmatprep.mubr.msk.f32.mxu0 %vm240_vm1, %v239_v0  ;;  %v42_v1 = vld [vmem:[#allocation3] sm:$0xff]  ;;  %v43_v2 = vld [vmem:[#allocation6] sm:$0xff]  ;;  %s241_s0 = smov [#allocation8]   ;;  %vm135_vm3 = vcmask 57344  }
  0x1b   :  { %158 = vmatpush3.xpose.msk.msra.mxu0 %vm45_vm2, %v42_v1  ;;  %s143_s1 = sshll.u32 %s241_s0, 4  ;;  %s144_s1 = int_to_ptr.vmem [resolvable:$true] %s143_s1 }
  0x1c   :  { %s211_s19 = scalar_lea.vmem %s144_s1, 16  ;;  %s215_s20 = scalar_lea.vmem %s144_s1, 32 }
  0x1d   :  { %p212_p10 = scmp.ne.s32.totalorder %s144_s1, %s211_s19  ;;  %p216_p11 = scmp.lt.s32.totalorder %s144_s1, %s144_s1 }
  0x1e   :  { %160 = vmatmul.mubr.msk.f32.vlgmr.msra.gmra.mxu0 %vm45_vm2, %v43_v2  ;;  %p217_p12 = scmp.lt.s32.totalorder %s215_s20, %s211_s19 }
  0x20   :  { %p218_p13 = por %p217_p12, %p216_p11 }
  0x21   :  { %v44_v3 = vld [vmem:[#allocation2] sm:$0xff] }
  0x22   :  { %p219_p0 = pnand %p218_p13, %p212_p10 }
  0xde   :  { %v118_v4 = vpop.f32.mrf.mxu0 }
  0xdf   :  { %v122_v5 = vadd.f32 %v118_v4, %v44_v3 }
  0xe0   :  { %v161_v6 = vpop.f32.mrf.mxu0 }
  0xe1   :  { %124 = vst.msk [vmem:[#allocation2] sm:$0xff] %vm40_vm0, %v122_v5 }
  0xe8   :  { %v128_v7 = vld [vmem:[#allocation2] sm:$0xff] }
  0xe9   :  { %v129_v8 = vsub.f32 0.0, %v128_v7 }
  0xeb   :  { %v130_v9 = vmul.f32 1.442695, %v129_v8 }
  0xed   :  { %167 = vpow2.f32 %v130_v9 }
  0xfa   :  { %v168_v10 = vpop.eup %167 }
  0xfb   :  { %v132_v11 = vadd.f32 1.0, %v168_v10 }
  0xfd   :  { %169 = vrcp.f32 %v132_v11 }
 0x10a   :  { %v170_v12 = vpop.eup %169 }
 0x10b   :  { %136 = vst.msk [vmem:[#allocation8] sm:$0x1] %vm135_vm3, %v170_v12 }
 0x10c   :  { %222 = shalt.err (!%p219_p0)
}
 0x10d   :  { %146 = dma.vmem_to_hbm [thread:$0]  %s144_s1, 16, %s268_s2, [#allocation5]  }
 0x10e   :  { %235 = dma.done.wait [#allocation5], 16  }
 0x10f   :  { %236 = vsyncadd [#allocation5], 4294967280 }
 0x110   :  { %150 = vsyncpa [#allocation4], 1 }
 0x111   :  { %151 = vsyncpa [#allocation7], 1 }
 0x112   :  { %152 = vsyncpa [#allocation5], 1 }

</bundles_post_ra>
